<compile_context>
chip_gen: v7x
topology: tpu7x:2x2x1
jax: 0.10.0
libtpu: 0.0.40
codegen_flags: <defaults>
</compile_context>

<pallas_src>
import functools

import jax
import jax.numpy as jnp
from jax.experimental import pallas as pl
from jax.experimental.pallas import tpu as pltpu

BN_EPS = 1e-5
LANES = 128


def mlp_kernel(x_ref, w1_ref, wh_ref, gb_ref, wo_ref, o_ref, h_ref, *, n_hidden):
    """Whole forward pass in one invocation.

    x_ref  : (B, D_in)          bf16
    w1_ref : (D_in, U)          bf16
    wh_ref : (max(n_hidden,1), U, U) bf16   hidden Linear weights (stacked)
    gb_ref : (max(n_hidden,1), 2, U) f32    [gamma; beta] per hidden layer
    wo_ref : (U, NC_PAD)        bf16        output Linear, lane-padded
    o_ref  : (B, NC_PAD)        f32
    h_ref  : (B, U)             f32 VMEM scratch carrying activations
    """
    # First layer: h = relu(x @ w1)
    h = jnp.dot(x_ref[...], w1_ref[...], preferred_element_type=jnp.float32)
    h_ref[...] = jnp.maximum(h, 0.0)

    # Hidden layers (n_hidden is a trace-time constant -> loop unrolls; for very
    # deep stacks a lax.fori_loop over wh_ref[l] would bound code size instead).
    for l in range(n_hidden):
        z = jnp.dot(h_ref[...].astype(jnp.bfloat16), wh_ref[l],
                    preferred_element_type=jnp.float32)
        # BatchNorm1d (training mode): biased batch stats over the batch axis,
        # two-pass variance for numerical safety; rsqrt on the tiny (1, U) row.
        mean = jnp.mean(z, axis=0, keepdims=True)            # (1, U)
        c = z - mean                                          # (B, U)
        var = jnp.mean(c * c, axis=0, keepdims=True)          # (1, U)
        gb = gb_ref[l]                                        # (2, U)
        scale = gb[0:1, :] * jax.lax.rsqrt(var + BN_EPS)      # gamma * inv_std
        h_ref[...] = jnp.maximum(c * scale + gb[1:2, :], 0.0)

    # Output layer (lane-dense padded store).
    o_ref[...] = jnp.dot(h_ref[...].astype(jnp.bfloat16), wo_ref[...],
                         preferred_element_type=jnp.float32)


def _vmem_capacity_bytes():
    """Per-core VMEM capacity; conservative 64 MiB fallback (v7x)."""
    try:
        info = pltpu.get_tpu_info()
        cap = getattr(info, "vmem_capacity_bytes", None)
        if cap:
            return int(cap)
    except Exception:
        pass
    return 64 << 20


@jax.jit
def mlp_forward(x, w1, wh, gamma, beta, wo):
    B = x.shape[0]
    x_flat = x.reshape(B, -1).astype(jnp.bfloat16)   # nn.Flatten + bf16 MXU operand
    D_in = x_flat.shape[1]
    U = w1.shape[1]
    n_classes = wo.shape[1]
    nc_pad = max(LANES, ((n_classes + LANES - 1) // LANES) * LANES)
    n_hidden = wh.shape[0]

    # bf16 matmul operands (f32 accumulate in-kernel); BN affine params stay f32.
    w1_b = w1.astype(jnp.bfloat16)
    wo_b = jnp.zeros((U, nc_pad), jnp.bfloat16).at[:, :n_classes].set(
        wo.astype(jnp.bfloat16))
    if n_hidden == 0:
        # Dummy (never-read) blocks keep shapes well-formed for n_layers == 1.
        wh_b = jnp.zeros((1, U, U), jnp.bfloat16)
        gb_f = jnp.zeros((1, 2, U), jnp.float32)
    else:
        wh_b = wh.astype(jnp.bfloat16)
        gb_f = jnp.concatenate([gamma, beta], axis=1).astype(jnp.float32)  # (H,2,U)

    # Everything is single-buffered & resident (no grid), plus headroom for the
    # in-kernel f32 temporaries (z, centered) and the activation scratch.
    vmem_bytes = (
        B * D_in * 2
        + D_in * U * 2
        + max(n_hidden, 1) * U * U * 2
        + max(n_hidden, 1) * 2 * U * 4
        + U * nc_pad * 2
        + B * nc_pad * 4
        + B * U * 4            # h scratch
        + 2 * B * U * 4        # f32 temporaries in the BN step
    )
    cap = _vmem_capacity_bytes()
    vmem_limit = int(min(max(vmem_bytes + (4 << 20), 8 << 20), cap))

    cost = pl.CostEstimate(
        flops=2 * B * (D_in * U + n_hidden * U * U + U * nc_pad),
        transcendentals=n_hidden * U,
        bytes_accessed=(B * D_in * 2 + D_in * U * 2
                        + max(n_hidden, 1) * U * U * 2
                        + max(n_hidden, 1) * 2 * U * 4
                        + U * nc_pad * 2 + B * nc_pad * 4),
    )

    vmem_spec = pl.BlockSpec(memory_space=pltpu.MemorySpace.VMEM)
    out = pl.pallas_call(
        functools.partial(mlp_kernel, n_hidden=n_hidden),
        out_shape=jax.ShapeDtypeStruct((B, nc_pad), jnp.float32),
        in_specs=[vmem_spec] * 5,
        out_specs=vmem_spec,
        scratch_shapes=[pltpu.VMEM((B, U), jnp.float32)],
        compiler_params=pltpu.CompilerParams(vmem_limit_bytes=vmem_limit),
        cost_estimate=cost,
    )(x_flat, w1_b, wh_b, gb_f, wo_b)

    return out[:, :n_classes]


def mlp_reference(x, w1, wh, gamma, beta, wo):
    """Pure-JAX reference mirroring the kernel's bf16-operand / f32-accumulate math."""
    B = x.shape[0]
    h = jnp.maximum(
        jnp.dot(x.reshape(B, -1).astype(jnp.bfloat16), w1.astype(jnp.bfloat16),
                preferred_element_type=jnp.float32), 0.0)
    for l in range(wh.shape[0]):
        z = jnp.dot(h.astype(jnp.bfloat16), wh[l].astype(jnp.bfloat16),
                    preferred_element_type=jnp.float32)
        mean = jnp.mean(z, axis=0, keepdims=True)
        c = z - mean
        var = jnp.mean(c * c, axis=0, keepdims=True)
        h = jnp.maximum(c * jax.lax.rsqrt(var + BN_EPS) * gamma[l] + beta[l], 0.0)
    return jnp.dot(h.astype(jnp.bfloat16), wo.astype(jnp.bfloat16),
                   preferred_element_type=jnp.float32)


def init_params(key, n_layers, n_units, n_channels, n_classes=10):
    """Deterministic parameter init (kaiming-uniform-like bounds, bias-free)."""
    d_in = 32 * 32 * n_channels
    k1, k2, k3 = jax.random.split(key, 3)

    def lin(k, fan_in, fan_out):
        bound = 1.0 / (fan_in ** 0.5)
        # stored as (in, out) == torch weight (out, in) transposed
        return jax.random.uniform(k, (fan_in, fan_out), jnp.float32, -bound, bound)

    w1 = lin(k1, d_in, n_units)
    n_hidden = n_layers - 1
    if n_hidden > 0:
        wh = jnp.stack(
            [lin(k, n_units, n_units) for k in jax.random.split(k2, n_hidden)])
    else:
        wh = jnp.zeros((0, n_units, n_units), jnp.float32)
    gamma = jnp.ones((n_hidden, 1, n_units), jnp.float32)   # BN weight init = 1
    beta = jnp.zeros((n_hidden, 1, n_units), jnp.float32)   # BN bias init = 0
    wo = lin(k3, n_units, n_classes)
    return w1, wh, gamma, beta, wo


if __name__ == "__main__":
    # Module hard-codes 32x32 spatial; keep channels/units/batch small.
    n_layers, n_units, n_channels, n_classes = 3, 128, 3, 10
    B = 8

    key = jax.random.PRNGKey(0)
    kx, kp = jax.random.split(key)
    x = jax.random.normal(kx, (B, n_channels, 32, 32), jnp.float32)
    params = init_params(kp, n_layers, n_units, n_channels, n_classes)

    logits = mlp_forward(x, *params)
    jax.block_until_ready(logits)
    assert logits.shape == (B, n_classes)
    assert bool(jnp.all(jnp.isfinite(logits)))

    ref = mlp_reference(x, *params)
    assert jnp.allclose(logits, ref, rtol=1e-2, atol=1e-2), float(
        jnp.max(jnp.abs(logits - ref)))
    print("KERNEL_OK")
</pallas_src>

<mosaic_0001>
module attributes {stable_mosaic.version = 11 : i64} {
  func.func @mlp_kernel(%arg0: memref<8x3072xbf16, #tpu.memory_space<vmem>>, %arg1: memref<3072x128xbf16, #tpu.memory_space<vmem>>, %arg2: memref<2x128x128xbf16, #tpu.memory_space<vmem>>, %arg3: memref<2x2x128xf32, #tpu.memory_space<vmem>>, %arg4: memref<128x128xbf16, #tpu.memory_space<vmem>>, %arg5: memref<8x128xf32, #tpu.memory_space<vmem>>, %arg6: memref<8x128xf32, #tpu.memory_space<vmem>>) attributes {dimension_semantics = [], scalar_prefetch = 0 : i64, scratch_operands = 1 : i64, tpu.core_type = #tpu.core_type<tc>} {
    %c0 = arith.constant 0 : index
    %c0_0 = arith.constant 0 : index
    %0 = vector.load %arg0[%c0, %c0_0] : memref<8x3072xbf16, #tpu.memory_space<vmem>>, vector<8x3072xbf16>
    %c0_1 = arith.constant 0 : index
    %c0_2 = arith.constant 0 : index
    %1 = vector.load %arg1[%c0_1, %c0_2] : memref<3072x128xbf16, #tpu.memory_space<vmem>>, vector<3072x128xbf16>
    %cst = arith.constant dense<0.000000e+00> : vector<8x128xf32>
    %2 = tpu.matmul %0, %1, %cst {dimension_numbers = #tpu.dot_dimension_numbers<[1], [0], [0], [1], [0, 0, 1, 1], [], []>} : vector<8x3072xbf16>, vector<3072x128xbf16>, vector<8x128xf32> -> vector<8x128xf32>
    %cst_3 = arith.constant 0.000000e+00 : f32
    %3 = vector.broadcast %cst_3 : f32 to vector<8x128xf32>
    %4 = arith.maximumf %2, %3 : vector<8x128xf32>
    %c0_4 = arith.constant 0 : index
    %c0_5 = arith.constant 0 : index
    %5 = vector.load %arg6[%c0_4, %c0_5] : memref<8x128xf32, #tpu.memory_space<vmem>>, vector<8x128xf32>
    tpu.vector_store %arg6[%c0_4, %c0_5], %4 {strides = array<i32>} : memref<8x128xf32, #tpu.memory_space<vmem>>, vector<8x128xf32>,
    %c0_6 = arith.constant 0 : index
    %c0_7 = arith.constant 0 : index
    %6 = vector.load %arg6[%c0_6, %c0_7] : memref<8x128xf32, #tpu.memory_space<vmem>>, vector<8x128xf32>
    %7 = arith.truncf %6 : vector<8x128xf32> to vector<8x128xbf16>
    %c0_8 = arith.constant 0 : index
    %c0_9 = arith.constant 0 : index
    %c0_10 = arith.constant 0 : index
    %8 = vector.load %arg2[%c0_8, %c0_9, %c0_10] : memref<2x128x128xbf16, #tpu.memory_space<vmem>>, vector<1x128x128xbf16>
    %9 = vector.shape_cast %8 : vector<1x128x128xbf16> to vector<128x128xbf16>
    %cst_11 = arith.constant dense<0.000000e+00> : vector<8x128xf32>
    %10 = tpu.matmul %7, %9, %cst_11 {dimension_numbers = #tpu.dot_dimension_numbers<[1], [0], [0], [1], [0, 0, 1, 1], [], []>} : vector<8x128xbf16>, vector<128x128xbf16>, vector<8x128xf32> -> vector<8x128xf32>
    %cst_12 = arith.constant dense<0.000000e+00> : vector<128xf32>
    %11 = vector.multi_reduction <add>, %10, %cst_12 [0] : vector<8x128xf32> to vector<128xf32>
    %12 = vector.shape_cast %11 : vector<128xf32> to vector<1x128xf32>
    %cst_13 = arith.constant 8.000000e+00 : f32
    %13 = vector.broadcast %cst_13 : f32 to vector<1x128xf32>
    %14 = arith.divf %12, %13 : vector<1x128xf32>
    %15 = vector.broadcast %14 : vector<1x128xf32> to vector<8x128xf32>
    %16 = arith.subf %10, %15 : vector<8x128xf32>
    %17 = arith.mulf %16, %16 : vector<8x128xf32>
    %cst_14 = arith.constant dense<0.000000e+00> : vector<128xf32>
    %18 = vector.multi_reduction <add>, %17, %cst_14 [0] : vector<8x128xf32> to vector<128xf32>
    %19 = vector.shape_cast %18 : vector<128xf32> to vector<1x128xf32>
    %cst_15 = arith.constant 8.000000e+00 : f32
    %20 = vector.broadcast %cst_15 : f32 to vector<1x128xf32>
    %21 = arith.divf %19, %20 : vector<1x128xf32>
    %c0_16 = arith.constant 0 : index
    %c0_17 = arith.constant 0 : index
    %c0_18 = arith.constant 0 : index
    %22 = vector.load %arg3[%c0_16, %c0_17, %c0_18] : memref<2x2x128xf32, #tpu.memory_space<vmem>>, vector<1x2x128xf32>
    %23 = vector.shape_cast %22 : vector<1x2x128xf32> to vector<2x128xf32>
    %24 = vector.extract_strided_slice %23 {offsets = [0, 0], sizes = [1, 128], strides = [1, 1]} : vector<2x128xf32> to vector<1x128xf32>
    %cst_19 = arith.constant 9.99999974E-6 : f32
    %25 = vector.broadcast %cst_19 : f32 to vector<1x128xf32>
    %26 = arith.addf %21, %25 : vector<1x128xf32>
    %27 = math.rsqrt %26 : vector<1x128xf32>
    %28 = arith.mulf %24, %27 : vector<1x128xf32>
    %29 = vector.broadcast %28 : vector<1x128xf32> to vector<8x128xf32>
    %30 = arith.mulf %16, %29 : vector<8x128xf32>
    %31 = vector.extract_strided_slice %23 {offsets = [1, 0], sizes = [1, 128], strides = [1, 1]} : vector<2x128xf32> to vector<1x128xf32>
    %32 = vector.broadcast %31 : vector<1x128xf32> to vector<8x128xf32>
    %33 = arith.addf %30, %32 : vector<8x128xf32>
    %cst_20 = arith.constant 0.000000e+00 : f32
    %34 = vector.broadcast %cst_20 : f32 to vector<8x128xf32>
    %35 = arith.maximumf %33, %34 : vector<8x128xf32>
    %c0_21 = arith.constant 0 : index
    %c0_22 = arith.constant 0 : index
    %36 = vector.load %arg6[%c0_21, %c0_22] : memref<8x128xf32, #tpu.memory_space<vmem>>, vector<8x128xf32>
    tpu.vector_store %arg6[%c0_21, %c0_22], %35 {strides = array<i32>} : memref<8x128xf32, #tpu.memory_space<vmem>>, vector<8x128xf32>,
    %c0_23 = arith.constant 0 : index
    %c0_24 = arith.constant 0 : index
    %37 = vector.load %arg6[%c0_23, %c0_24] : memref<8x128xf32, #tpu.memory_space<vmem>>, vector<8x128xf32>
    %38 = arith.truncf %37 : vector<8x128xf32> to vector<8x128xbf16>
    %c1 = arith.constant 1 : index
    %c0_25 = arith.constant 0 : index
    %c0_26 = arith.constant 0 : index
    %39 = vector.load %arg2[%c1, %c0_25, %c0_26] : memref<2x128x128xbf16, #tpu.memory_space<vmem>>, vector<1x128x128xbf16>
    %40 = vector.shape_cast %39 : vector<1x128x128xbf16> to vector<128x128xbf16>
    %cst_27 = arith.constant dense<0.000000e+00> : vector<8x128xf32>
    %41 = tpu.matmul %38, %40, %cst_27 {dimension_numbers = #tpu.dot_dimension_numbers<[1], [0], [0], [1], [0, 0, 1, 1], [], []>} : vector<8x128xbf16>, vector<128x128xbf16>, vector<8x128xf32> -> vector<8x128xf32>
    %cst_28 = arith.constant dense<0.000000e+00> : vector<128xf32>
    %42 = vector.multi_reduction <add>, %41, %cst_28 [0] : vector<8x128xf32> to vector<128xf32>
    %43 = vector.shape_cast %42 : vector<128xf32> to vector<1x128xf32>
    %cst_29 = arith.constant 8.000000e+00 : f32
    %44 = vector.broadcast %cst_29 : f32 to vector<1x128xf32>
    %45 = arith.divf %43, %44 : vector<1x128xf32>
    %46 = vector.broadcast %45 : vector<1x128xf32> to vector<8x128xf32>
    %47 = arith.subf %41, %46 : vector<8x128xf32>
    %48 = arith.mulf %47, %47 : vector<8x128xf32>
    %cst_30 = arith.constant dense<0.000000e+00> : vector<128xf32>
    %49 = vector.multi_reduction <add>, %48, %cst_30 [0] : vector<8x128xf32> to vector<128xf32>
    %50 = vector.shape_cast %49 : vector<128xf32> to vector<1x128xf32>
    %cst_31 = arith.constant 8.000000e+00 : f32
    %51 = vector.broadcast %cst_31 : f32 to vector<1x128xf32>
    %52 = arith.divf %50, %51 : vector<1x128xf32>
    %c1_32 = arith.constant 1 : index
    %c0_33 = arith.constant 0 : index
    %c0_34 = arith.constant 0 : index
    %53 = vector.load %arg3[%c1_32, %c0_33, %c0_34] : memref<2x2x128xf32, #tpu.memory_space<vmem>>, vector<1x2x128xf32>
    %54 = vector.shape_cast %53 : vector<1x2x128xf32> to vector<2x128xf32>
    %55 = vector.extract_strided_slice %54 {offsets = [0, 0], sizes = [1, 128], strides = [1, 1]} : vector<2x128xf32> to vector<1x128xf32>
    %cst_35 = arith.constant 9.99999974E-6 : f32
    %56 = vector.broadcast %cst_35 : f32 to vector<1x128xf32>
    %57 = arith.addf %52, %56 : vector<1x128xf32>
    %58 = math.rsqrt %57 : vector<1x128xf32>
    %59 = arith.mulf %55, %58 : vector<1x128xf32>
    %60 = vector.broadcast %59 : vector<1x128xf32> to vector<8x128xf32>
    %61 = arith.mulf %47, %60 : vector<8x128xf32>
    %62 = vector.extract_strided_slice %54 {offsets = [1, 0], sizes = [1, 128], strides = [1, 1]} : vector<2x128xf32> to vector<1x128xf32>
    %63 = vector.broadcast %62 : vector<1x128xf32> to vector<8x128xf32>
    %64 = arith.addf %61, %63 : vector<8x128xf32>
    %cst_36 = arith.constant 0.000000e+00 : f32
    %65 = vector.broadcast %cst_36 : f32 to vector<8x128xf32>
    %66 = arith.maximumf %64, %65 : vector<8x128xf32>
    %c0_37 = arith.constant 0 : index
    %c0_38 = arith.constant 0 : index
    %67 = vector.load %arg6[%c0_37, %c0_38] : memref<8x128xf32, #tpu.memory_space<vmem>>, vector<8x128xf32>
    tpu.vector_store %arg6[%c0_37, %c0_38], %66 {strides = array<i32>} : memref<8x128xf32, #tpu.memory_space<vmem>>, vector<8x128xf32>,
    %c0_39 = arith.constant 0 : index
    %c0_40 = arith.constant 0 : index
    %68 = vector.load %arg6[%c0_39, %c0_40] : memref<8x128xf32, #tpu.memory_space<vmem>>, vector<8x128xf32>
    %69 = arith.truncf %68 : vector<8x128xf32> to vector<8x128xbf16>
    %c0_41 = arith.constant 0 : index
    %c0_42 = arith.constant 0 : index
    %70 = vector.load %arg4[%c0_41, %c0_42] : memref<128x128xbf16, #tpu.memory_space<vmem>>, vector<128x128xbf16>
    %cst_43 = arith.constant dense<0.000000e+00> : vector<8x128xf32>
    %71 = tpu.matmul %69, %70, %cst_43 {dimension_numbers = #tpu.dot_dimension_numbers<[1], [0], [0], [1], [0, 0, 1, 1], [], []>} : vector<8x128xbf16>, vector<128x128xbf16>, vector<8x128xf32> -> vector<8x128xf32>
    %c0_44 = arith.constant 0 : index
    %c0_45 = arith.constant 0 : index
    %72 = vector.load %arg5[%c0_44, %c0_45] : memref<8x128xf32, #tpu.memory_space<vmem>>, vector<8x128xf32>
    tpu.vector_store %arg5[%c0_44, %c0_45], %71 {strides = array<i32>} : memref<8x128xf32, #tpu.memory_space<vmem>>, vector<8x128xf32>,
    return
  }
}

</mosaic_0001>

<bundles_post_ra>
// kernel: mlp_forward.1
= control target key start
LH: loop header
LB: loop body
LE: loop exit
PB: predicated region body
PF: predicated region fallthrough
CT: control target
= control target key end

     0   :  { %s4184_s0 = inlined_call_operand.vmem [shape: bf16[8,3072], index: 0, kind: input, shape index: {}]   ;;  %s4185_s1 = inlined_call_operand.vmem [shape: bf16[3072,128], index: 1, kind: input, shape index: {}]   ;;  %s4186_s2 = inlined_call_operand.vmem [shape: bf16[2,128,128], index: 2, kind: input, shape index: {}]   ;;  %s4187_s3 = inlined_call_operand.vmem [shape: f32[2,2,128], index: 3, kind: input, shape index: {}]   ;;  %s4188_s4 = inlined_call_operand.vmem [shape: bf16[128,128], index: 4, kind: input, shape index: {}]   ;;  %s4189_s5 = inlined_call_operand.hbm [shape: f32[8,128], index: 5, kind: output, shape index: {}]  }
   0x1   :  { %v3147_v0 = vld [vmem:[%s4185_s1 + $0x40] sm:$0xff]   ;;  %v3151_v4 = vld [vmem:[%s4185_s1 + $0x48] sm:$0xff]   ;;  %v3155_v8 = vld [vmem:[%s4185_s1 + $0x50] sm:$0xff]  }
   0x2   :  { %v3148_v1 = vld [vmem:[%s4185_s1 + $0xc0] sm:$0xff]   ;;  %2793 = vmatprep.subr.bf16.mxu0 %v3147_v0  ;;  %v3152_v5 = vld [vmem:[%s4185_s1 + $0xc8] sm:$0xff]   ;;  %v3156_v9 = vld [vmem:[%s4185_s1 + $0xd0] sm:$0xff]  }
   0x3   :  { %v3149_v2 = vld [vmem:[%s4185_s1] sm:$0xff]   ;;  %2815 = vmatprep.subr.bf16.mxu1 %v3148_v1  ;;  %v3153_v6 = vld [vmem:[%s4185_s1 + $0x8] sm:$0xff]   ;;  %v3157_v10 = vld [vmem:[%s4185_s1 + $0x10] sm:$0xff]  }
   0x4   :  { %v3150_v3 = vld [vmem:[%s4185_s1 + $0x80] sm:$0xff]   ;;  %2794 = vmatpush3.bf16.msra.mxu0 %v3149_v2  ;;  %v3154_v7 = vld [vmem:[%s4185_s1 + $0x88] sm:$0xff]   ;;  %v3158_v11 = vld [vmem:[%s4185_s1 + $0x90] sm:$0xff]  }
   0x5   :  { %2816 = vmatpush3.bf16.msra.mxu1 %v3150_v3  ;;  %2795 = vmatprep.subr.bf16.mxu0 %v3151_v4  ;;  %v3159_v12 = vld [vmem:[%s4185_s1 + $0x58] sm:$0xff]   ;;  %v3163_v16 = vld [vmem:[%s4185_s1 + $0x60] sm:$0xff]   ;;  %v3167_v20 = vld [vmem:[%s4185_s1 + $0x68] sm:$0xff]  }
   0x6   :  { %2817 = vmatprep.subr.bf16.mxu1 %v3152_v5  ;;  %v3160_v13 = vld [vmem:[%s4185_s1 + $0xd8] sm:$0xff]   ;;  %v3164_v17 = vld [vmem:[%s4185_s1 + $0xe0] sm:$0xff]   ;;  %v3168_v21 = vld [vmem:[%s4185_s1 + $0xe8] sm:$0xff]  }
   0x7   :  { %v3161_v14 = vld [vmem:[%s4185_s1 + $0x18] sm:$0xff]   ;;  %v3165_v18 = vld [vmem:[%s4185_s1 + $0x20] sm:$0xff]   ;;  %v3169_v22 = vld [vmem:[%s4185_s1 + $0x28] sm:$0xff]  }
   0x8   :  { %2796 = vmatpush3.bf16.msra.mxu0 %v3153_v6  ;;  %v3162_v15 = vld [vmem:[%s4185_s1 + $0x98] sm:$0xff]   ;;  %v3166_v19 = vld [vmem:[%s4185_s1 + $0xa0] sm:$0xff]   ;;  %v3170_v23 = vld [vmem:[%s4185_s1 + $0xa8] sm:$0xff]  }
   0x9   :  { %2818 = vmatpush3.bf16.msra.mxu1 %v3154_v7  ;;  %2797 = vmatprep.subr.bf16.mxu0 %v3155_v8  ;;  %v3171_v24 = vld [vmem:[%s4185_s1 + $0x70] sm:$0xff]   ;;  %v3175_v28 = vld [vmem:[%s4185_s1 + $0x78] sm:$0xff]   ;;  %v22_v32 = vld [vmem:[%s4184_s0] sm:$0xff] }
   0xa   :  { %2819 = vmatprep.subr.bf16.mxu1 %v3156_v9  ;;  %v3172_v25 = vld [vmem:[%s4185_s1 + $0xf0] sm:$0xff]   ;;  %v3176_v29 = vld [vmem:[%s4185_s1 + $0xf8] sm:$0xff]   ;;  %v23_v33 = vld [vmem:[%s4184_s0 + $0x8] sm:$0xff]  ;;  %v2536_v34 = vcombine.low %v22_v32, %v22_v32  ;;  %v2537_v35 = vcombine.high %v22_v32, %v22_v32 }
   0xb   :  { %v3173_v26 = vld [vmem:[%s4185_s1 + $0x30] sm:$0xff]   ;;  %v3177_v30 = vld [vmem:[%s4185_s1 + $0x38] sm:$0xff]   ;;  %v2538_v36 = vcombine.low %v23_v33, %v23_v33  ;;  %v2539_v37 = vcombine.high %v23_v33, %v23_v33  ;;  %v3183_v38 = vld [vmem:[%s4185_s1 + $0x140] sm:$0xff]  }
   0xc   :  { %2798 = vmatpush3.bf16.msra.mxu0 %v3157_v10  ;;  %v3174_v27 = vld [vmem:[%s4185_s1 + $0xb0] sm:$0xff]   ;;  %v3178_v31 = vld [vmem:[%s4185_s1 + $0xb8] sm:$0xff]   ;;  %v3184_v39 = vld [vmem:[%s4185_s1 + $0x1c0] sm:$0xff]   ;;  %1686 = vmatprep.mubr.bf16.mxu0 %v2537_v35 }
   0xd   :  { %2820 = vmatpush3.bf16.msra.mxu1 %v3158_v11  ;;  %2799 = vmatprep.subr.bf16.mxu0 %v3159_v12  ;;  %v3185_v40 = vld [vmem:[%s4185_s1 + $0x100] sm:$0xff]   ;;  %v3187_v42 = vld [vmem:[%s4185_s1 + $0x148] sm:$0xff]   ;;  %v3191_v46 = vld [vmem:[%s4185_s1 + $0x150] sm:$0xff]  }
   0xe   :  { %2821 = vmatprep.subr.bf16.mxu1 %v3160_v13  ;;  %1726 = vmatprep.mubr.bf16.mxu1 %v2539_v37  ;;  %v3186_v41 = vld [vmem:[%s4185_s1 + $0x180] sm:$0xff]   ;;  %v3188_v43 = vld [vmem:[%s4185_s1 + $0x1c8] sm:$0xff]   ;;  %v3192_v47 = vld [vmem:[%s4185_s1 + $0x1d0] sm:$0xff]  }
   0xf   :  { %v3189_v44 = vld [vmem:[%s4185_s1 + $0x108] sm:$0xff]   ;;  %v3193_v48 = vld [vmem:[%s4185_s1 + $0x110] sm:$0xff]   ;;  %v3195_v50 = vld [vmem:[%s4185_s1 + $0x158] sm:$0xff]  }
  0x10   :  { %2800 = vmatpush3.bf16.msra.mxu0 %v3161_v14  ;;  %v3190_v45 = vld [vmem:[%s4185_s1 + $0x188] sm:$0xff]   ;;  %v3194_v49 = vld [vmem:[%s4185_s1 + $0x190] sm:$0xff]   ;;  %v3196_v51 = vld [vmem:[%s4185_s1 + $0x1d8] sm:$0xff]  }
  0x11   :  { %2822 = vmatpush3.bf16.msra.mxu1 %v3162_v15  ;;  %2801 = vmatprep.subr.bf16.mxu0 %v3163_v16  ;;  %v3197_v52 = vld [vmem:[%s4185_s1 + $0x118] sm:$0xff]   ;;  %v3199_v54 = vld [vmem:[%s4185_s1 + $0x160] sm:$0xff]   ;;  %v3203_v58 = vld [vmem:[%s4185_s1 + $0x168] sm:$0xff]  }
  0x12   :  { %2823 = vmatprep.subr.bf16.mxu1 %v3164_v17  ;;  %v3198_v53 = vld [vmem:[%s4185_s1 + $0x198] sm:$0xff]   ;;  %v3200_v55 = vld [vmem:[%s4185_s1 + $0x1e0] sm:$0xff]   ;;  %v3204_v59 = vld [vmem:[%s4185_s1 + $0x1e8] sm:$0xff]  }
  0x13   :  { %v3201_v56 = vld [vmem:[%s4185_s1 + $0x120] sm:$0xff]   ;;  %v3205_v60 = vld [vmem:[%s4185_s1 + $0x128] sm:$0xff]   ;;  %v3207_v62 = vld [vmem:[%s4185_s1 + $0x170] sm:$0xff]  }
  0x14   :  { %2802 = vmatpush3.bf16.msra.mxu0 %v3165_v18  ;;  %v3202_v57 = vld [vmem:[%s4185_s1 + $0x1a0] sm:$0xff]   ;;  %v3206_v61 = vld [vmem:[%s4185_s1 + $0x1a8] sm:$0xff]   ;;  %v3208_v63 = vld [vmem:[%s4185_s1 + $0x1f0] sm:$0xff]  }
  0x15   :  { %2824 = vmatpush3.bf16.msra.mxu1 %v3166_v19  ;;  %2803 = vmatprep.subr.bf16.mxu0 %v3167_v20  ;;  %v3209_v0 = vld [vmem:[%s4185_s1 + $0x130] sm:$0xff]   ;;  %v3211_v2 = vld [vmem:[%s4185_s1 + $0x178] sm:$0xff]   ;;  %v3219_v12 = vld [vmem:[%s4185_s1 + $0x240] sm:$0xff]  }
  0x16   :  { %2825 = vmatprep.subr.bf16.mxu1 %v3168_v21  ;;  %v3210_v1 = vld [vmem:[%s4185_s1 + $0x1b0] sm:$0xff]   ;;  %v3212_v3 = vld [vmem:[%s4185_s1 + $0x1f8] sm:$0xff]   ;;  %v3220_v13 = vld [vmem:[%s4185_s1 + $0x2c0] sm:$0xff]  }
  0x17   :  { %v3213_v4 = vld [vmem:[%s4185_s1 + $0x138] sm:$0xff]   ;;  %v24_v6 = vld [vmem:[%s4184_s0 + $0x10] sm:$0xff]  ;;  %v3221_v14 = vld [vmem:[%s4185_s1 + $0x200] sm:$0xff]  }
  0x18   :  { %2804 = vmatpush3.bf16.msra.mxu0 %v3169_v22  ;;  %v3214_v5 = vld [vmem:[%s4185_s1 + $0x1b8] sm:$0xff]   ;;  %v2540_v7 = vcombine.low %v24_v6, %v24_v6  ;;  %v2541_v8 = vcombine.high %v24_v6, %v24_v6  ;;  %v3222_v15 = vld [vmem:[%s4185_s1 + $0x280] sm:$0xff]   ;;  %v3223_v16 = vld [vmem:[%s4185_s1 + $0x248] sm:$0xff]  }
  0x19   :  { %2826 = vmatpush3.bf16.msra.mxu1 %v3170_v23  ;;  %2805 = vmatprep.subr.bf16.mxu0 %v3171_v24  ;;  %v25_v9 = vld [vmem:[%s4184_s0 + $0x18] sm:$0xff]  ;;  %v3224_v17 = vld [vmem:[%s4185_s1 + $0x2c8] sm:$0xff]   ;;  %v3227_v20 = vld [vmem:[%s4185_s1 + $0x250] sm:$0xff]  }
  0x1a   :  { %2827 = vmatprep.subr.bf16.mxu1 %v3172_v25  ;;  %v2542_v10 = vcombine.low %v25_v9, %v25_v9  ;;  %v2543_v11 = vcombine.high %v25_v9, %v25_v9  ;;  %v3225_v18 = vld [vmem:[%s4185_s1 + $0x208] sm:$0xff]   ;;  %v3228_v21 = vld [vmem:[%s4185_s1 + $0x2d0] sm:$0xff]   ;;  %v3231_v24 = vld [vmem:[%s4185_s1 + $0x258] sm:$0xff]  }
  0x1b   :  { %v3226_v19 = vld [vmem:[%s4185_s1 + $0x288] sm:$0xff]   ;;  %v3229_v22 = vld [vmem:[%s4185_s1 + $0x210] sm:$0xff]   ;;  %v3232_v25 = vld [vmem:[%s4185_s1 + $0x2d8] sm:$0xff]  }
  0x1c   :  { %2806 = vmatpush3.bf16.msra.mxu0 %v3173_v26  ;;  %v3230_v23 = vld [vmem:[%s4185_s1 + $0x290] sm:$0xff]   ;;  %v3233_v26 = vld [vmem:[%s4185_s1 + $0x218] sm:$0xff]   ;;  %v3239_v32 = vld [vmem:[%s4185_s1 + $0x268] sm:$0xff]  }
  0x1d   :  { %2828 = vmatpush3.bf16.msra.mxu1 %v3174_v27  ;;  %2807 = vmatprep.subr.bf16.mxu0 %v3175_v28  ;;  %v3234_v27 = vld [vmem:[%s4185_s1 + $0x298] sm:$0xff]   ;;  %v3235_v28 = vld [vmem:[%s4185_s1 + $0x260] sm:$0xff]   ;;  %v3240_v33 = vld [vmem:[%s4185_s1 + $0x2e8] sm:$0xff]  }
  0x1e   :  { %2829 = vmatprep.subr.bf16.mxu1 %v3176_v29  ;;  %v3236_v29 = vld [vmem:[%s4185_s1 + $0x2e0] sm:$0xff]   ;;  %v3242_v35 = vld [vmem:[%s4185_s1 + $0x2a8] sm:$0xff]   ;;  %v3244_v37 = vld [vmem:[%s4185_s1 + $0x2f0] sm:$0xff]  }
  0x1f   :  { %v3275_v6 = vld [vmem:[%s4185_s1 + $0x368] sm:$0xff]  }
  0x20   :  { %2808 = vmatpush3.bf16.msra.mxu0 %v3177_v30  ;;  %v3237_v30 = vld [vmem:[%s4185_s1 + $0x220] sm:$0xff]   ;;  %v3278_v9 = vld [vmem:[%s4185_s1 + $0x3a8] sm:$0xff]  }
  0x21   :  { %2830 = vmatpush3.bf16.msra.mxu1 %v3178_v31  ;;  %2837 = vmatprep.subr.bf16.mxu0 %v3183_v38  ;;  %v3238_v31 = vld [vmem:[%s4185_s1 + $0x2a0] sm:$0xff]   ;;  %v3245_v38 = vld [vmem:[%s4185_s1 + $0x230] sm:$0xff]  }
  0x22   :  { %2859 = vmatprep.subr.bf16.mxu1 %v3184_v39  ;;  %v3246_v39 = vld [vmem:[%s4185_s1 + $0x2b0] sm:$0xff]  }
  0x23   :  { %1687 = vmatmul.mubr.bf16.vlgmr.msra.gmra.mrb[0].mxu0 %v2536_v34  ;;  %v3241_v34 = vld [vmem:[%s4185_s1 + $0x228] sm:$0xff]  }
  0x24   :  { %1727 = vmatmul.mubr.bf16.vlgmr.msra.gmra.mrb[0].mxu1 %v2538_v36  ;;  %2838 = vmatpush3.bf16.msra.mxu0 %v3185_v40  ;;  %v3243_v36 = vld [vmem:[%s4185_s1 + $0x270] sm:$0xff]   ;;  %v3247_v40 = vld [vmem:[%s4185_s1 + $0x278] sm:$0xff]  }
  0x25   :  { %2860 = vmatpush3.bf16.msra.mxu1 %v3186_v41  ;;  %2839 = vmatprep.subr.bf16.mxu0 %v3187_v42  ;;  %v3248_v41 = vld [vmem:[%s4185_s1 + $0x2f8] sm:$0xff]  }
  0x26   :  { %2861 = vmatprep.subr.bf16.mxu1 %v3188_v43  ;;  %1766 = vmatprep.mubr.bf16.mxu0 %v2541_v8  ;;  %v3249_v42 = vld [vmem:[%s4185_s1 + $0x238] sm:$0xff]   ;;  %v3277_v8 = vld [vmem:[%s4185_s1 + $0x328] sm:$0xff]  }
  0x27   :  { %1806 = vmatprep.mubr.bf16.mxu1 %v2543_v11  ;;  %v3250_v43 = vld [vmem:[%s4185_s1 + $0x2b8] sm:$0xff]   ;;  %v3280_v11 = vld [vmem:[%s4185_s1 + $0x3f0] sm:$0xff]  }
  0x28   :  { %2840 = vmatpush3.bf16.msra.mxu0 %v3189_v44  ;;  %v26_v44 = vld [vmem:[%s4184_s0 + $0x20] sm:$0xff] }
  0x29   :  { %2862 = vmatpush3.bf16.msra.mxu1 %v3190_v45  ;;  %2841 = vmatprep.subr.bf16.mxu0 %v3191_v46  ;;  %v27_v45 = vld [vmem:[%s4184_s0 + $0x28] sm:$0xff]  ;;  %v2544_v46 = vcombine.low %v26_v44, %v26_v44 }
  0x2a   :  { %2863 = vmatprep.subr.bf16.mxu1 %v3192_v47  ;;  %v2545_v47 = vcombine.high %v26_v44, %v26_v44  ;;  %v3311_v44 = vld [vmem:[%s4185_s1 + $0x468] sm:$0xff]  }
  0x2c   :  { %2842 = vmatpush3.bf16.msra.mxu0 %v3193_v48  ;;  %v2546_v48 = vcombine.low %v27_v45, %v27_v45 }
  0x2d   :  { %2864 = vmatpush3.bf16.msra.mxu1 %v3194_v49  ;;  %2843 = vmatprep.subr.bf16.mxu0 %v3195_v50  ;;  %v2547_v49 = vcombine.high %v27_v45, %v27_v45  ;;  %v3255_v50 = vld [vmem:[%s4185_s1 + $0x340] sm:$0xff]   ;;  %v3312_v45 = vld [vmem:[%s4185_s1 + $0x4e8] sm:$0xff]  }
  0x2e   :  { %2865 = vmatprep.subr.bf16.mxu1 %v3196_v51  ;;  %v3256_v51 = vld [vmem:[%s4185_s1 + $0x3c0] sm:$0xff]  }
  0x30   :  { %2844 = vmatpush3.bf16.msra.mxu0 %v3197_v52  ;;  %v3257_v52 = vld [vmem:[%s4185_s1 + $0x300] sm:$0xff]  }
  0x31   :  { %2866 = vmatpush3.bf16.msra.mxu1 %v3198_v53  ;;  %2845 = vmatprep.subr.bf16.mxu0 %v3199_v54  ;;  %v3258_v53 = vld [vmem:[%s4185_s1 + $0x380] sm:$0xff]   ;;  %v3259_v54 = vld [vmem:[%s4185_s1 + $0x348] sm:$0xff]  }
  0x32   :  { %2867 = vmatprep.subr.bf16.mxu1 %v3200_v55  ;;  %v3260_v55 = vld [vmem:[%s4185_s1 + $0x3c8] sm:$0xff]  }
  0x34   :  { %2846 = vmatpush3.bf16.msra.mxu0 %v3201_v56  ;;  %v3261_v56 = vld [vmem:[%s4185_s1 + $0x308] sm:$0xff]  }
  0x35   :  { %2868 = vmatpush3.bf16.msra.mxu1 %v3202_v57  ;;  %2847 = vmatprep.subr.bf16.mxu0 %v3203_v58  ;;  %v3262_v57 = vld [vmem:[%s4185_s1 + $0x388] sm:$0xff]   ;;  %v3263_v58 = vld [vmem:[%s4185_s1 + $0x350] sm:$0xff]  }
  0x36   :  { %2869 = vmatprep.subr.bf16.mxu1 %v3204_v59  ;;  %v3264_v59 = vld [vmem:[%s4185_s1 + $0x3d0] sm:$0xff]  }
  0x38   :  { %2848 = vmatpush3.bf16.msra.mxu0 %v3205_v60  ;;  %v3265_v60 = vld [vmem:[%s4185_s1 + $0x310] sm:$0xff]  }
  0x39   :  { %2870 = vmatpush3.bf16.msra.mxu1 %v3206_v61  ;;  %2849 = vmatprep.subr.bf16.mxu0 %v3207_v62  ;;  %v3266_v61 = vld [vmem:[%s4185_s1 + $0x390] sm:$0xff]   ;;  %v3267_v62 = vld [vmem:[%s4185_s1 + $0x358] sm:$0xff]  }
  0x3a   :  { %2871 = vmatprep.subr.bf16.mxu1 %v3208_v63  ;;  %v3268_v63 = vld [vmem:[%s4185_s1 + $0x3d8] sm:$0xff]  }
  0x3c   :  { %2850 = vmatpush3.bf16.msra.mxu0 %v3209_v0  ;;  %v3269_v0 = vld [vmem:[%s4185_s1 + $0x318] sm:$0xff]  }
  0x3d   :  { %2872 = vmatpush3.bf16.msra.mxu1 %v3210_v1  ;;  %2851 = vmatprep.subr.bf16.mxu0 %v3211_v2  ;;  %v3270_v1 = vld [vmem:[%s4185_s1 + $0x398] sm:$0xff]   ;;  %v3271_v2 = vld [vmem:[%s4185_s1 + $0x360] sm:$0xff]  }
  0x3e   :  { %2873 = vmatprep.subr.bf16.mxu1 %v3212_v3  ;;  %v3272_v3 = vld [vmem:[%s4185_s1 + $0x3e0] sm:$0xff]  }
  0x40   :  { %2852 = vmatpush3.bf16.msra.mxu0 %v3213_v4  ;;  %v3273_v4 = vld [vmem:[%s4185_s1 + $0x320] sm:$0xff]  }
  0x41   :  { %2874 = vmatpush3.bf16.msra.mxu1 %v3214_v5  ;;  %2881 = vmatprep.subr.bf16.mxu0 %v3219_v12  ;;  %v3274_v5 = vld [vmem:[%s4185_s1 + $0x3a0] sm:$0xff]   ;;  %v3281_v12 = vld [vmem:[%s4185_s1 + $0x330] sm:$0xff]  }
  0x42   :  { %2903 = vmatprep.subr.bf16.mxu1 %v3220_v13  ;;  %v3282_v13 = vld [vmem:[%s4185_s1 + $0x3b0] sm:$0xff]  }
  0x43   :  { %1767 = vmatmul.mubr.bf16.vlgmr.msra.gmra.mrb[4].mxu0 %v2540_v7  ;;  %v3276_v7 = vld [vmem:[%s4185_s1 + $0x3e8] sm:$0xff]  }
  0x44   :  { %1807 = vmatmul.mubr.bf16.vlgmr.msra.gmra.mrb[4].mxu1 %v2542_v10  ;;  %2882 = vmatpush3.bf16.msra.mxu0 %v3221_v14  ;;  %v3279_v10 = vld [vmem:[%s4185_s1 + $0x370] sm:$0xff]   ;;  %v3283_v14 = vld [vmem:[%s4185_s1 + $0x378] sm:$0xff]  }
  0x45   :  { %2904 = vmatpush3.bf16.msra.mxu1 %v3222_v15  ;;  %2883 = vmatprep.subr.bf16.mxu0 %v3223_v16  ;;  %v3284_v15 = vld [vmem:[%s4185_s1 + $0x3f8] sm:$0xff]  }
  0x46   :  { %2905 = vmatprep.subr.bf16.mxu1 %v3224_v17  ;;  %1846 = vmatprep.mubr.bf16.mxu0 %v2545_v47  ;;  %v3285_v16 = vld [vmem:[%s4185_s1 + $0x338] sm:$0xff]   ;;  %v3314_v47 = vld [vmem:[%s4185_s1 + $0x4a8] sm:$0xff]  }
  0x47   :  { %1886 = vmatprep.mubr.bf16.mxu1 %v2547_v49  ;;  %v3286_v17 = vld [vmem:[%s4185_s1 + $0x3b8] sm:$0xff]   ;;  %v3316_v49 = vld [vmem:[%s4185_s1 + $0x4f0] sm:$0xff]  }
  0x48   :  { %2884 = vmatpush3.bf16.msra.mxu0 %v3225_v18  ;;  %v28_v18 = vld [vmem:[%s4184_s0 + $0x30] sm:$0xff] }
  0x49   :  { %2906 = vmatpush3.bf16.msra.mxu1 %v3226_v19  ;;  %2885 = vmatprep.subr.bf16.mxu0 %v3227_v20  ;;  %v29_v19 = vld [vmem:[%s4184_s0 + $0x38] sm:$0xff]  ;;  %v2548_v20 = vcombine.low %v28_v18, %v28_v18 }
  0x4a   :  { %2907 = vmatprep.subr.bf16.mxu1 %v3228_v21  ;;  %v2549_v21 = vcombine.high %v28_v18, %v28_v18  ;;  %v3347_v18 = vld [vmem:[%s4185_s1 + $0x568] sm:$0xff]  }
  0x4c   :  { %2886 = vmatpush3.bf16.msra.mxu0 %v3229_v22  ;;  %v2550_v22 = vcombine.low %v29_v19, %v29_v19 }
  0x4d   :  { %2908 = vmatpush3.bf16.msra.mxu1 %v3230_v23  ;;  %2887 = vmatprep.subr.bf16.mxu0 %v3231_v24  ;;  %v3291_v23 = vld [vmem:[%s4185_s1 + $0x440] sm:$0xff]   ;;  %v2551_v24 = vcombine.high %v29_v19, %v29_v19  ;;  %v3348_v19 = vld [vmem:[%s4185_s1 + $0x5e8] sm:$0xff]  }
  0x4e   :  { %2909 = vmatprep.subr.bf16.mxu1 %v3232_v25  ;;  %v3292_v25 = vld [vmem:[%s4185_s1 + $0x4c0] sm:$0xff]  }
  0x50   :  { %2888 = vmatpush3.bf16.msra.mxu0 %v3233_v26  ;;  %v3293_v26 = vld [vmem:[%s4185_s1 + $0x400] sm:$0xff]  }
  0x51   :  { %2910 = vmatpush3.bf16.msra.mxu1 %v3234_v27  ;;  %2889 = vmatprep.subr.bf16.mxu0 %v3235_v28  ;;  %v3294_v27 = vld [vmem:[%s4185_s1 + $0x480] sm:$0xff]   ;;  %v3295_v28 = vld [vmem:[%s4185_s1 + $0x448] sm:$0xff]  }
  0x52   :  { %2911 = vmatprep.subr.bf16.mxu1 %v3236_v29  ;;  %v3296_v29 = vld [vmem:[%s4185_s1 + $0x4c8] sm:$0xff]  }
  0x54   :  { %2890 = vmatpush3.bf16.msra.mxu0 %v3237_v30  ;;  %v3297_v30 = vld [vmem:[%s4185_s1 + $0x408] sm:$0xff]  }
  0x55   :  { %2912 = vmatpush3.bf16.msra.mxu1 %v3238_v31  ;;  %2891 = vmatprep.subr.bf16.mxu0 %v3239_v32  ;;  %v3298_v31 = vld [vmem:[%s4185_s1 + $0x488] sm:$0xff]   ;;  %v3299_v32 = vld [vmem:[%s4185_s1 + $0x450] sm:$0xff]  }
  0x56   :  { %2913 = vmatprep.subr.bf16.mxu1 %v3240_v33  ;;  %v3300_v33 = vld [vmem:[%s4185_s1 + $0x4d0] sm:$0xff]  }
  0x58   :  { %2892 = vmatpush3.bf16.msra.mxu0 %v3241_v34  ;;  %v3301_v34 = vld [vmem:[%s4185_s1 + $0x410] sm:$0xff]  }
  0x59   :  { %2914 = vmatpush3.bf16.msra.mxu1 %v3242_v35  ;;  %2893 = vmatprep.subr.bf16.mxu0 %v3243_v36  ;;  %v3302_v35 = vld [vmem:[%s4185_s1 + $0x490] sm:$0xff]   ;;  %v3303_v36 = vld [vmem:[%s4185_s1 + $0x458] sm:$0xff]  }
  0x5a   :  { %2915 = vmatprep.subr.bf16.mxu1 %v3244_v37  ;;  %v3304_v37 = vld [vmem:[%s4185_s1 + $0x4d8] sm:$0xff]  }
  0x5c   :  { %2894 = vmatpush3.bf16.msra.mxu0 %v3245_v38  ;;  %v3305_v38 = vld [vmem:[%s4185_s1 + $0x418] sm:$0xff]  }
  0x5d   :  { %2916 = vmatpush3.bf16.msra.mxu1 %v3246_v39  ;;  %2895 = vmatprep.subr.bf16.mxu0 %v3247_v40  ;;  %v3306_v39 = vld [vmem:[%s4185_s1 + $0x498] sm:$0xff]   ;;  %v3307_v40 = vld [vmem:[%s4185_s1 + $0x460] sm:$0xff]  }
  0x5e   :  { %2917 = vmatprep.subr.bf16.mxu1 %v3248_v41  ;;  %v3308_v41 = vld [vmem:[%s4185_s1 + $0x4e0] sm:$0xff]  }
  0x60   :  { %2896 = vmatpush3.bf16.msra.mxu0 %v3249_v42  ;;  %v3309_v42 = vld [vmem:[%s4185_s1 + $0x420] sm:$0xff]  }
  0x61   :  { %2918 = vmatpush3.bf16.msra.mxu1 %v3250_v43  ;;  %2925 = vmatprep.subr.bf16.mxu0 %v3255_v50  ;;  %v3310_v43 = vld [vmem:[%s4185_s1 + $0x4a0] sm:$0xff]   ;;  %v3317_v50 = vld [vmem:[%s4185_s1 + $0x430] sm:$0xff]  }
  0x62   :  { %2947 = vmatprep.subr.bf16.mxu1 %v3256_v51  ;;  %v3318_v51 = vld [vmem:[%s4185_s1 + $0x4b0] sm:$0xff]  }
  0x63   :  { %1847 = vmatmul.mubr.bf16.vlgmr.msra.gmra.mrb[8].mxu0 %v2544_v46  ;;  %v3313_v46 = vld [vmem:[%s4185_s1 + $0x428] sm:$0xff]  }
  0x64   :  { %1887 = vmatmul.mubr.bf16.vlgmr.msra.gmra.mrb[8].mxu1 %v2546_v48  ;;  %2926 = vmatpush3.bf16.msra.mxu0 %v3257_v52  ;;  %v3315_v48 = vld [vmem:[%s4185_s1 + $0x470] sm:$0xff]   ;;  %v3319_v52 = vld [vmem:[%s4185_s1 + $0x478] sm:$0xff]  }
  0x65   :  { %2948 = vmatpush3.bf16.msra.mxu1 %v3258_v53  ;;  %2927 = vmatprep.subr.bf16.mxu0 %v3259_v54  ;;  %v3320_v53 = vld [vmem:[%s4185_s1 + $0x4f8] sm:$0xff]  }
  0x66   :  { %2949 = vmatprep.subr.bf16.mxu1 %v3260_v55  ;;  %1926 = vmatprep.mubr.bf16.mxu0 %v2549_v21  ;;  %v3321_v54 = vld [vmem:[%s4185_s1 + $0x438] sm:$0xff]   ;;  %v3350_v21 = vld [vmem:[%s4185_s1 + $0x5a8] sm:$0xff]  }
  0x67   :  { %1966 = vmatprep.mubr.bf16.mxu1 %v2551_v24  ;;  %v3322_v55 = vld [vmem:[%s4185_s1 + $0x4b8] sm:$0xff]   ;;  %v3353_v24 = vld [vmem:[%s4185_s1 + $0x530] sm:$0xff]  }
  0x68   :  { %2928 = vmatpush3.bf16.msra.mxu0 %v3261_v56  ;;  %v30_v56 = vld [vmem:[%s4184_s0 + $0x40] sm:$0xff] }
  0x69   :  { %2950 = vmatpush3.bf16.msra.mxu1 %v3262_v57  ;;  %2929 = vmatprep.subr.bf16.mxu0 %v3263_v58  ;;  %v2552_v57 = vcombine.low %v30_v56, %v30_v56  ;;  %v2553_v58 = vcombine.high %v30_v56, %v30_v56 }
  0x6a   :  { %2951 = vmatprep.subr.bf16.mxu1 %v3264_v59  ;;  %v31_v59 = vld [vmem:[%s4184_s0 + $0x48] sm:$0xff] }
  0x6c   :  { %2930 = vmatpush3.bf16.msra.mxu0 %v3265_v60  ;;  %v2554_v60 = vcombine.low %v31_v59, %v31_v59 }
  0x6d   :  { %2952 = vmatpush3.bf16.msra.mxu1 %v3266_v61  ;;  %2931 = vmatprep.subr.bf16.mxu0 %v3267_v62  ;;  %v2555_v61 = vcombine.high %v31_v59, %v31_v59  ;;  %v3327_v62 = vld [vmem:[%s4185_s1 + $0x540] sm:$0xff]  }
  0x6e   :  { %2953 = vmatprep.subr.bf16.mxu1 %v3268_v63  ;;  %v3328_v63 = vld [vmem:[%s4185_s1 + $0x5c0] sm:$0xff]  }
  0x70   :  { %2932 = vmatpush3.bf16.msra.mxu0 %v3269_v0  ;;  %v3329_v0 = vld [vmem:[%s4185_s1 + $0x500] sm:$0xff]  }
  0x71   :  { %2954 = vmatpush3.bf16.msra.mxu1 %v3270_v1  ;;  %2933 = vmatprep.subr.bf16.mxu0 %v3271_v2  ;;  %v3330_v1 = vld [vmem:[%s4185_s1 + $0x580] sm:$0xff]   ;;  %v3331_v2 = vld [vmem:[%s4185_s1 + $0x548] sm:$0xff]  }
  0x72   :  { %2955 = vmatprep.subr.bf16.mxu1 %v3272_v3  ;;  %v3332_v3 = vld [vmem:[%s4185_s1 + $0x5c8] sm:$0xff]  }
  0x74   :  { %2934 = vmatpush3.bf16.msra.mxu0 %v3273_v4  ;;  %v3333_v4 = vld [vmem:[%s4185_s1 + $0x508] sm:$0xff]  }
  0x75   :  { %2956 = vmatpush3.bf16.msra.mxu1 %v3274_v5  ;;  %2935 = vmatprep.subr.bf16.mxu0 %v3275_v6  ;;  %v3334_v5 = vld [vmem:[%s4185_s1 + $0x588] sm:$0xff]   ;;  %v3335_v6 = vld [vmem:[%s4185_s1 + $0x550] sm:$0xff]  }
  0x76   :  { %2957 = vmatprep.subr.bf16.mxu1 %v3276_v7  ;;  %v3336_v7 = vld [vmem:[%s4185_s1 + $0x5d0] sm:$0xff]  }
  0x78   :  { %2936 = vmatpush3.bf16.msra.mxu0 %v3277_v8  ;;  %v3337_v8 = vld [vmem:[%s4185_s1 + $0x510] sm:$0xff]  }
  0x79   :  { %2958 = vmatpush3.bf16.msra.mxu1 %v3278_v9  ;;  %2937 = vmatprep.subr.bf16.mxu0 %v3279_v10  ;;  %v3338_v9 = vld [vmem:[%s4185_s1 + $0x590] sm:$0xff]   ;;  %v3339_v10 = vld [vmem:[%s4185_s1 + $0x558] sm:$0xff]  }
  0x7a   :  { %2959 = vmatprep.subr.bf16.mxu1 %v3280_v11  ;;  %v3340_v11 = vld [vmem:[%s4185_s1 + $0x5d8] sm:$0xff]  }
  0x7c   :  { %2938 = vmatpush3.bf16.msra.mxu0 %v3281_v12  ;;  %v3341_v12 = vld [vmem:[%s4185_s1 + $0x518] sm:$0xff]  }
  0x7d   :  { %2960 = vmatpush3.bf16.msra.mxu1 %v3282_v13  ;;  %2939 = vmatprep.subr.bf16.mxu0 %v3283_v14  ;;  %v3342_v13 = vld [vmem:[%s4185_s1 + $0x598] sm:$0xff]   ;;  %v3343_v14 = vld [vmem:[%s4185_s1 + $0x560] sm:$0xff]  }
  0x7e   :  { %2961 = vmatprep.subr.bf16.mxu1 %v3284_v15  ;;  %v3344_v15 = vld [vmem:[%s4185_s1 + $0x5e0] sm:$0xff]  }
  0x80   :  { %2940 = vmatpush3.bf16.msra.mxu0 %v3285_v16  ;;  %v3345_v16 = vld [vmem:[%s4185_s1 + $0x520] sm:$0xff]  }
  0x81   :  { %2962 = vmatpush3.bf16.msra.mxu1 %v3286_v17  ;;  %2969 = vmatprep.subr.bf16.mxu0 %v3291_v23  ;;  %v3346_v17 = vld [vmem:[%s4185_s1 + $0x5a0] sm:$0xff]   ;;  %v3352_v23 = vld [vmem:[%s4185_s1 + $0x5f0] sm:$0xff]  }
  0x82   :  { %2991 = vmatprep.subr.bf16.mxu1 %v3292_v25  ;;  %v3354_v25 = vld [vmem:[%s4185_s1 + $0x5b0] sm:$0xff]  }
  0x83   :  { %1927 = vmatmul.mubr.bf16.vlgmr.msra.gmra.mrb[12].mxu0 %v2548_v20  ;;  %v3349_v20 = vld [vmem:[%s4185_s1 + $0x528] sm:$0xff]  }
  0x84   :  { %1967 = vmatmul.mubr.bf16.vlgmr.msra.gmra.mrb[12].mxu1 %v2550_v22  ;;  %2970 = vmatpush3.bf16.msra.mxu0 %v3293_v26  ;;  %v3351_v22 = vld [vmem:[%s4185_s1 + $0x570] sm:$0xff]   ;;  %v3355_v26 = vld [vmem:[%s4185_s1 + $0x578] sm:$0xff]  }
  0x85   :  { %2992 = vmatpush3.bf16.msra.mxu1 %v3294_v27  ;;  %2971 = vmatprep.subr.bf16.mxu0 %v3295_v28  ;;  %v3356_v27 = vld [vmem:[%s4185_s1 + $0x5f8] sm:$0xff]  }
  0x86   :  { %2993 = vmatprep.subr.bf16.mxu1 %v3296_v29  ;;  %2006 = vmatprep.mubr.bf16.mxu0 %v2553_v58  ;;  %v3357_v28 = vld [vmem:[%s4185_s1 + $0x538] sm:$0xff]  }
  0x87   :  { %2046 = vmatprep.mubr.bf16.mxu1 %v2555_v61  ;;  %v3358_v29 = vld [vmem:[%s4185_s1 + $0x5b8] sm:$0xff]  }
  0x88   :  { %2972 = vmatpush3.bf16.msra.mxu0 %v3297_v30  ;;  %v32_v30 = vld [vmem:[%s4184_s0 + $0x50] sm:$0xff] }
  0x89   :  { %2994 = vmatpush3.bf16.msra.mxu1 %v3298_v31  ;;  %2973 = vmatprep.subr.bf16.mxu0 %v3299_v32  ;;  %v33_v31 = vld [vmem:[%s4184_s0 + $0x58] sm:$0xff]  ;;  %v2556_v32 = vcombine.low %v32_v30, %v32_v30 }
  0x8a   :  { %2995 = vmatprep.subr.bf16.mxu1 %v3300_v33  ;;  %v2557_v33 = vcombine.high %v32_v30, %v32_v30 }
  0x8c   :  { %2974 = vmatpush3.bf16.msra.mxu0 %v3301_v34  ;;  %v2558_v34 = vcombine.low %v33_v31, %v33_v31 }
  0x8d   :  { %2996 = vmatpush3.bf16.msra.mxu1 %v3302_v35  ;;  %2975 = vmatprep.subr.bf16.mxu0 %v3303_v36  ;;  %v2559_v35 = vcombine.high %v33_v31, %v33_v31 }
  0x8e   :  { %2997 = vmatprep.subr.bf16.mxu1 %v3304_v37 }
  0x90   :  { %2976 = vmatpush3.bf16.msra.mxu0 %v3305_v38 }
  0x91   :  { %2998 = vmatpush3.bf16.msra.mxu1 %v3306_v39  ;;  %2977 = vmatprep.subr.bf16.mxu0 %v3307_v40 }
  0x92   :  { %2999 = vmatprep.subr.bf16.mxu1 %v3308_v41 }
  0x94   :  { %2978 = vmatpush3.bf16.msra.mxu0 %v3309_v42 }
  0x95   :  { %3000 = vmatpush3.bf16.msra.mxu1 %v3310_v43  ;;  %2979 = vmatprep.subr.bf16.mxu0 %v3311_v44 }
  0x96   :  { %3001 = vmatprep.subr.bf16.mxu1 %v3312_v45 }
  0x98   :  { %2980 = vmatpush3.bf16.msra.mxu0 %v3313_v46 }
  0x99   :  { %3002 = vmatpush3.bf16.msra.mxu1 %v3314_v47  ;;  %2981 = vmatprep.subr.bf16.mxu0 %v3315_v48 }
  0x9a   :  { %3003 = vmatprep.subr.bf16.mxu1 %v3316_v49 }
  0x9c   :  { %2982 = vmatpush3.bf16.msra.mxu0 %v3317_v50 }
  0x9d   :  { %3004 = vmatpush3.bf16.msra.mxu1 %v3318_v51  ;;  %2983 = vmatprep.subr.bf16.mxu0 %v3319_v52 }
  0x9e   :  { %3005 = vmatprep.subr.bf16.mxu1 %v3320_v53 }
  0xa0   :  { %2984 = vmatpush3.bf16.msra.mxu0 %v3321_v54 }
  0xa1   :  { %3006 = vmatpush3.bf16.msra.mxu1 %v3322_v55  ;;  %3013 = vmatprep.subr.bf16.mxu0 %v3327_v62 }
  0xa2   :  { %3035 = vmatprep.subr.bf16.mxu1 %v3328_v63 }
  0xa3   :  { %2007 = vmatmul.mubr.bf16.vlgmr.msra.gmra.mrb[16].mxu0 %v2552_v57 }
  0xa4   :  { %2047 = vmatmul.mubr.bf16.vlgmr.msra.gmra.mrb[16].mxu1 %v2554_v60  ;;  %3014 = vmatpush3.bf16.msra.mxu0 %v3329_v0 }
  0xa5   :  { %3036 = vmatpush3.bf16.msra.mxu1 %v3330_v1  ;;  %3015 = vmatprep.subr.bf16.mxu0 %v3331_v2 }
  0xa6   :  { %3037 = vmatprep.subr.bf16.mxu1 %v3332_v3  ;;  %2086 = vmatprep.mubr.bf16.mxu0 %v2557_v33 }
  0xa7   :  { %2126 = vmatprep.mubr.bf16.mxu1 %v2559_v35 }
  0xa8   :  { %3016 = vmatpush3.bf16.msra.mxu0 %v3333_v4 }
  0xa9   :  { %3038 = vmatpush3.bf16.msra.mxu1 %v3334_v5  ;;  %3017 = vmatprep.subr.bf16.mxu0 %v3335_v6 }
  0xaa   :  { %3039 = vmatprep.subr.bf16.mxu1 %v3336_v7 }
  0xac   :  { %3018 = vmatpush3.bf16.msra.mxu0 %v3337_v8 }
  0xad   :  { %3040 = vmatpush3.bf16.msra.mxu1 %v3338_v9  ;;  %3019 = vmatprep.subr.bf16.mxu0 %v3339_v10 }
  0xae   :  { %3041 = vmatprep.subr.bf16.mxu1 %v3340_v11 }
  0xb0   :  { %3020 = vmatpush3.bf16.msra.mxu0 %v3341_v12 }
  0xb1   :  { %3042 = vmatpush3.bf16.msra.mxu1 %v3342_v13  ;;  %3021 = vmatprep.subr.bf16.mxu0 %v3343_v14 }
  0xb2   :  { %3043 = vmatprep.subr.bf16.mxu1 %v3344_v15 }
  0xb4   :  { %3022 = vmatpush3.bf16.msra.mxu0 %v3345_v16 }
  0xb5   :  { %3044 = vmatpush3.bf16.msra.mxu1 %v3346_v17  ;;  %3023 = vmatprep.subr.bf16.mxu0 %v3347_v18 }
  0xb6   :  { %3045 = vmatprep.subr.bf16.mxu1 %v3348_v19 }
  0xb8   :  { %3024 = vmatpush3.bf16.msra.mxu0 %v3349_v20 }
  0xb9   :  { %3046 = vmatpush3.bf16.msra.mxu1 %v3350_v21  ;;  %3025 = vmatprep.subr.bf16.mxu0 %v3351_v22 }
  0xba   :  { %3047 = vmatprep.subr.bf16.mxu1 %v3352_v23 }
  0xbc   :  { %3026 = vmatpush3.bf16.msra.mxu0 %v3353_v24 }
  0xbd   :  { %3048 = vmatpush3.bf16.msra.mxu1 %v3354_v25  ;;  %3027 = vmatprep.subr.bf16.mxu0 %v3355_v26 }
  0xbe   :  { %3049 = vmatprep.subr.bf16.mxu1 %v3356_v27 }
  0xc0   :  { %3028 = vmatpush3.bf16.msra.mxu0 %v3357_v28 }
  0xc1   :  { %3050 = vmatpush3.bf16.msra.mxu1 %v3358_v29 }
  0xc3   :  { %2087 = vmatmul.mubr.bf16.vlgmr.msra.gmra.mrb[20].mxu0 %v2556_v32 }
  0xc4   :  { %2127 = vmatmul.mubr.bf16.vlgmr.msra.gmra.mrb[20].mxu1 %v2558_v34 }
  0xc5   :  { %10 = vsyncpa [#allocation4], 0  ;;  %v3363_v47 = vld [vmem:[%s4186_s2] sm:$0xff]   ;;  %v3415_v48 = vmov 0.0   ;;  %v3364_v49 = vld [vmem:[%s4186_s2 + $0x8] sm:$0xff]   ;;  %vm3416_vm0 = vmmov 0  }
  0xc6   :  { %3084 = vmatprep.subr.bf16.mxu0 %v3415_v48  ;;  %3104 = vmatprep.subr.bf16.mxu1 %v3415_v48  ;;  %v3365_v50 = vld [vmem:[%s4186_s2 + $0x10] sm:$0xff]   ;;  %v3366_v51 = vld [vmem:[%s4186_s2 + $0x18] sm:$0xff]   ;;  %v3367_v52 = vld [vmem:[%s4186_s2 + $0x20] sm:$0xff]   ;;  %s3417_s22 = smov [#allocation3]  }
  0xc7   :  { %3085 = vmatpush3.bf16.msra.mxu0 %v3363_v47  ;;  %v3368_v61 = vld [vmem:[%s4186_s2 + $0x28] sm:$0xff]   ;;  %v3369_v2 = vld [vmem:[%s4186_s2 + $0x30] sm:$0xff]   ;;  %v3370_v3 = vld [vmem:[%s4186_s2 + $0x38] sm:$0xff]   ;;  %3100 = vmatprep.mubr.msk.bf16.mxu0 %vm3416_vm0, %v3415_v48  ;;  %s2528_s23 = sshll.u32 %s3417_s22, 4  ;;  %s2529_s23 = int_to_ptr.vmem [resolvable:$true] %s2528_s23 }
  0xc8   :  { %3086 = vmatprep.subr.bf16.mxu0 %v3415_v48  ;;  %3120 = vmatprep.mubr.msk.bf16.mxu1 %vm3416_vm0, %v3415_v48  ;;  %s3391_s24 = scalar_lea.vmem %s2529_s23, 128  ;;  %p3396_p1 = scmp.lt.s32.totalorder %s2529_s23, %s2529_s23 }
  0xc9   :  { %p3392_p0 = scmp.ne.s32.totalorder %s2529_s23, %s3391_s24  ;;  %p3397_p2 = scmp.lt.s32.totalorder %s3391_s24, %s3391_s24 }
  0xcb   :  { %3087 = vmatpush3.bf16.msra.mxu0 %v3364_v49  ;;  %p3398_p3 = por %p3397_p2, %p3396_p1 }
  0xcc   :  { %3088 = vmatprep.subr.bf16.mxu0 %v3415_v48 }
  0xcd   :  { %p3399_p4 = pnand %p3398_p3, %p3392_p0 }
  0xcf   :  { %3089 = vmatpush3.bf16.msra.mxu0 %v3365_v50 }
  0xd0   :  { %3090 = vmatprep.subr.bf16.mxu0 %v3415_v48 }
  0xd3   :  { %3091 = vmatpush3.bf16.msra.mxu0 %v3366_v51 }
  0xd4   :  { %3092 = vmatprep.subr.bf16.mxu0 %v3415_v48 }
  0xd7   :  { %3093 = vmatpush3.bf16.msra.mxu0 %v3367_v52 }
  0xd8   :  { %3094 = vmatprep.subr.bf16.mxu0 %v3415_v48 }
  0xdb   :  { %3095 = vmatpush3.bf16.msra.mxu0 %v3368_v61  ;;  %v3377_v61 = vld [vmem:[%s4186_s2 + $0x70] sm:$0xff]  }
  0xdc   :  { %3096 = vmatprep.subr.bf16.mxu0 %v3415_v48 }
  0xdf   :  { %3097 = vmatpush3.bf16.msra.mxu0 %v3369_v2 }
  0xe0   :  { %3098 = vmatprep.subr.bf16.mxu0 %v3415_v48 }
  0xe3   :  { %3099 = vmatpush3.bf16.msra.mxu0 %v3370_v3 }
  0xe4   :  { %3124 = vmatprep.subr.bf16.mxu0 %v3415_v48 }
  0xf6   :  { %v2809_v36 = vpop.f32.mrb[0].mxu0 }
  0xf7   :  { %v2831_v37 = vpop.f32.mrb[0].mxu1  ;;  %v2810_v38 = vpop.f32.mrb[1].mxu0 }
  0xf8   :  { %v2832_v39 = vpop.f32.mrb[1].mxu1  ;;  %v2811_v40 = vadd.f32 %v2810_v38, %v2809_v36  ;;  %v2812_v42 = vpop.f32.mrb[2].mxu0 }
  0xf9   :  { %v2833_v41 = vadd.f32 %v2832_v39, %v2831_v37  ;;  %v2834_v43 = vpop.f32.mrb[2].mxu1  ;;  %v2813_v44 = vpop.f32.mrb[3].mxu0 }
  0xfa   :  { %v2835_v45 = vpop.f32.mrb[3].mxu1 }
  0xfb   :  { %v1729_v46 = vadd.f32 %v2833_v41, %v2811_v40 }
 0x116   :  { %v2853_v53 = vpop.f32.mrb[4].mxu0 }
 0x117   :  { %v2875_v54 = vpop.f32.mrb[4].mxu1  ;;  %v2854_v55 = vpop.f32.mrb[5].mxu0 }
 0x118   :  { %v2876_v56 = vpop.f32.mrb[5].mxu1  ;;  %v2855_v57 = vadd.f32 %v2854_v55, %v2853_v53  ;;  %v2856_v59 = vpop.f32.mrb[6].mxu0  ;;  %v3371_v55 = vld [vmem:[%s4186_s2 + $0x40] sm:$0xff]  }
 0x119   :  { %v2877_v58 = vadd.f32 %v2876_v56, %v2875_v54  ;;  %v2878_v60 = vpop.f32.mrb[6].mxu1  ;;  %v2857_v62 = vpop.f32.mrb[7].mxu0  ;;  %3105 = vmatpush3.bf16.msra.mxu1 %v3371_v55  ;;  %v3372_v56 = vld [vmem:[%s4186_s2 + $0x48] sm:$0xff]   ;;  %v3375_v59 = vld [vmem:[%s4186_s2 + $0x60] sm:$0xff]  }
 0x11a   :  { %v2879_v63 = vpop.f32.mrb[7].mxu1  ;;  %v1769_v0 = vadd.f32 %v2855_v57, %v1729_v46  ;;  %3106 = vmatprep.subr.bf16.mxu1 %v3415_v48  ;;  %v3373_v57 = vld [vmem:[%s4186_s2 + $0x50] sm:$0xff]   ;;  %v3376_v60 = vld [vmem:[%s4186_s2 + $0x68] sm:$0xff]   ;;  %v3378_v62 = vld [vmem:[%s4186_s2 + $0x78] sm:$0xff]  }
 0x11c   :  { %v1809_v1 = vadd.f32 %v2877_v58, %v1769_v0  ;;  %v3374_v58 = vld [vmem:[%s4186_s2 + $0x58] sm:$0xff]  }
 0x11d   :  { %3107 = vmatpush3.bf16.msra.mxu1 %v3372_v56 }
 0x11e   :  { %3108 = vmatprep.subr.bf16.mxu1 %v3415_v48 }
 0x121   :  { %3109 = vmatpush3.bf16.msra.mxu1 %v3373_v57 }
 0x122   :  { %3110 = vmatprep.subr.bf16.mxu1 %v3415_v48 }
 0x125   :  { %3111 = vmatpush3.bf16.msra.mxu1 %v3374_v58 }
 0x126   :  { %3112 = vmatprep.subr.bf16.mxu1 %v3415_v48 }
 0x129   :  { %3113 = vmatpush3.bf16.msra.mxu1 %v3375_v59 }
 0x12a   :  { %3114 = vmatprep.subr.bf16.mxu1 %v3415_v48 }
 0x12d   :  { %3115 = vmatpush3.bf16.msra.mxu1 %v3376_v60 }
 0x12e   :  { %3116 = vmatprep.subr.bf16.mxu1 %v3415_v48 }
 0x131   :  { %3117 = vmatpush3.bf16.msra.mxu1 %v3377_v61 }
 0x132   :  { %3118 = vmatprep.subr.bf16.mxu1 %v3415_v48 }
 0x135   :  { %3119 = vmatpush3.bf16.msra.mxu1 %v3378_v62  ;;  %v2784_v62 = vld [vmem:[%s4187_s3 + $0x2] sm:$0x3] }
 0x136   :  { %v2897_v4 = vpop.f32.mrb[8].mxu0 }
 0x137   :  { %v2919_v5 = vpop.f32.mrb[8].mxu1  ;;  %v2898_v6 = vpop.f32.mrb[9].mxu0 }
 0x138   :  { %v2899_v7 = vadd.f32 %v2898_v6, %v2897_v4  ;;  %v2920_v8 = vpop.f32.mrb[9].mxu1  ;;  %v2900_v9 = vpop.f32.mrb[10].mxu0 }
 0x139   :  { %v2921_v10 = vadd.f32 %v2920_v8, %v2919_v5  ;;  %v2922_v11 = vpop.f32.mrb[10].mxu1  ;;  %v2901_v12 = vpop.f32.mrb[11].mxu0 }
 0x13a   :  { %v1849_v13 = vadd.f32 %v2899_v7, %v1809_v1  ;;  %v2923_v14 = vpop.f32.mrb[11].mxu1 }
 0x13c   :  { %v1889_v15 = vadd.f32 %v2921_v10, %v1849_v13 }
 0x156   :  { %v2941_v16 = vpop.f32.mrb[12].mxu0 }
 0x157   :  { %v2963_v17 = vpop.f32.mrb[12].mxu1  ;;  %v2942_v18 = vpop.f32.mrb[13].mxu0 }
 0x158   :  { %v2943_v19 = vadd.f32 %v2942_v18, %v2941_v16  ;;  %v2964_v20 = vpop.f32.mrb[13].mxu1  ;;  %v2944_v21 = vpop.f32.mrb[14].mxu0 }
 0x159   :  { %v2965_v22 = vadd.f32 %v2964_v20, %v2963_v17  ;;  %v2966_v23 = vpop.f32.mrb[14].mxu1  ;;  %v2945_v24 = vpop.f32.mrb[15].mxu0  ;;  %v2263_v20 = vlaneseq }
 0x15a   :  { %v1929_v25 = vadd.f32 %v2943_v19, %v1889_v15  ;;  %v2967_v26 = vpop.f32.mrb[15].mxu1 }
 0x15b   :  { %v4131_v21 = vshrl.u32 %v2263_v20, 7 }
 0x15c   :  { %v1969_v27 = vadd.f32 %v2965_v22, %v1929_v25  ;;  %v2259_v22 = vld [vmem:[%s4187_s3] sm:$0x3] }
 0x15d   :  { %v2265_v23 = vsub.s32 0, %v4131_v21  ;;  %v2270_v24 = vsub.s32 1, %v4131_v21 }
 0x176   :  { %v2985_v28 = vpop.f32.mrb[16].mxu0 }
 0x177   :  { %v3007_v29 = vpop.f32.mrb[16].mxu1  ;;  %v2986_v30 = vpop.f32.mrb[17].mxu0 }
 0x178   :  { %v3008_v31 = vpop.f32.mrb[17].mxu1  ;;  %v2987_v32 = vadd.f32 %v2986_v30, %v2985_v28  ;;  %v2988_v34 = vpop.f32.mrb[18].mxu0  ;;  %v2271_v28 = vrot.slane %v2259_v22, %v2270_v24 }
 0x179   :  { %v3009_v33 = vadd.f32 %v3008_v31, %v3007_v29  ;;  %v3010_v35 = vpop.f32.mrb[18].mxu1  ;;  %v2989_v36 = vpop.f32.mrb[19].mxu0  ;;  %v3380_v34 = vld [vmem:[%s4188_s4 + $0x8] sm:$0xff]  }
 0x17a   :  { %v3011_v37 = vpop.f32.mrb[19].mxu1  ;;  %v2009_v38 = vadd.f32 %v2987_v32, %v1969_v27  ;;  %v3381_v35 = vld [vmem:[%s4188_s4 + $0x10] sm:$0xff]   ;;  %v3382_v36 = vld [vmem:[%s4188_s4 + $0x18] sm:$0xff]  }
 0x17b   :  { %v3383_v37 = vld [vmem:[%s4188_s4 + $0x20] sm:$0xff]  }
 0x17c   :  { %v2049_v39 = vadd.f32 %v3009_v33, %v2009_v38  ;;  %v3379_v33 = vld [vmem:[%s4188_s4] sm:$0xff]   ;;  %v3384_v38 = vld [vmem:[%s4188_s4 + $0x28] sm:$0xff]  }
 0x196   :  { %v3029_v40 = vpop.f32.mrb[20].mxu0 }
 0x197   :  { %v3051_v41 = vpop.f32.mrb[20].mxu1  ;;  %v3030_v42 = vpop.f32.mrb[21].mxu0 }
 0x198   :  { %v3031_v43 = vadd.f32 %v3030_v42, %v3029_v40  ;;  %v3052_v44 = vpop.f32.mrb[21].mxu1  ;;  %v3032_v45 = vpop.f32.mrb[22].mxu0  ;;  %v3386_v40 = vld [vmem:[%s4188_s4 + $0x38] sm:$0xff]  }
 0x199   :  { %v3053_v46 = vadd.f32 %v3052_v44, %v3051_v41  ;;  %v3054_v47 = vpop.f32.mrb[22].mxu1  ;;  %v3033_v49 = vpop.f32.mrb[23].mxu0 }
 0x19a   :  { %v2089_v50 = vadd.f32 %v3031_v43, %v2049_v39  ;;  %v3055_v51 = vpop.f32.mrb[23].mxu1  ;;  %v3385_v39 = vld [vmem:[%s4188_s4 + $0x30] sm:$0xff]  }
 0x19c   :  { %v2129_v52 = vadd.f32 %v3053_v46, %v2089_v50 }
 0x19e   :  { %v2134_v53 = vmax.f32 %v2129_v52, 0.0 }
 0x1a0   :  { %v2137_v54 = vpack.c.bf16 %v2134_v53, %v2134_v53 }
 0x1a2   :  { %3101 = vmatmul.mubr.bf16.vlgmr.msra.gmra.mrb[24].mxu0 %v2137_v54 }
 0x1a3   :  { %3140 = vmatprep.mubr.msk.bf16.mxu0 %vm3416_vm0, %v3415_v48  ;;  %3125 = vmatpush3.bf16.msra.mxu0 %v3379_v33 }
 0x1a4   :  { %3126 = vmatprep.subr.bf16.mxu0 %v3415_v48 }
 0x1a7   :  { %3127 = vmatpush3.bf16.msra.mxu0 %v3380_v34 }
 0x1a8   :  { %3128 = vmatprep.subr.bf16.mxu0 %v3415_v48 }
 0x1ab   :  { %3129 = vmatpush3.bf16.msra.mxu0 %v3381_v35 }
 0x1ac   :  { %3130 = vmatprep.subr.bf16.mxu0 %v3415_v48 }
 0x1af   :  { %3131 = vmatpush3.bf16.msra.mxu0 %v3382_v36 }
 0x1b0   :  { %3132 = vmatprep.subr.bf16.mxu0 %v3415_v48 }
 0x1b3   :  { %3133 = vmatpush3.bf16.msra.mxu0 %v3383_v37 }
 0x1b4   :  { %3134 = vmatprep.subr.bf16.mxu0 %v3415_v48 }
 0x1b7   :  { %3135 = vmatpush3.bf16.msra.mxu0 %v3384_v38 }
 0x1b8   :  { %3136 = vmatprep.subr.bf16.mxu0 %v3415_v48 }
 0x1bb   :  { %3137 = vmatpush3.bf16.msra.mxu0 %v3385_v39 }
 0x1bc   :  { %3138 = vmatprep.subr.bf16.mxu0 %v3415_v48 }
 0x1bf   :  { %3139 = vmatpush3.bf16.msra.mxu0 %v3386_v40 }
 0x275   :  { %v2236_v63 = vpop.f32.mrb[24].mxu0 }
 0x276   :  { %v2242_v0 = vrot.slane %v2236_v63, 4  ;;  %v3102_v1 = vpop.f32.mrb[25].mxu0 }
 0x277   :  { %v2239_v2 = vpop.f32.mrb[26].mxu0 }
 0x278   :  { %v2243_v3 = vadd.f32 %v2242_v0, %v2236_v63  ;;  %v3103_v4 = vpop.f32.mrb[27].mxu0  ;;  %v2411_v2 = vrot.slane %v2784_v62, %v2270_v24 }
 0x27a   :  { %v2244_v5 = vrot.slane %v2243_v3, 2 }
 0x27c   :  { %v2245_v6 = vadd.f32 %v2244_v5, %v2243_v3 }
 0x27e   :  { %v2246_v7 = vrot.slane %v2245_v6, 1 }
 0x280   :  { %v2247_v8 = vadd.f32 %v2246_v7, %v2245_v6 }
 0x282   :  { %v2249_v9 = vmul.f32 0.125, %v2247_v8 }
 0x284   :  { %v2250_v10 = vsub.f32 %v2236_v63, %v2249_v9 }
 0x286   :  { %v2251_v11 = vmul.f32 %v2250_v10, %v2250_v10 }
 0x288   :  { %v2252_v12 = vrot.slane %v2251_v11, 4 }
 0x28a   :  { %v2253_v13 = vadd.f32 %v2252_v12, %v2251_v11 }
 0x28c   :  { %v2254_v14 = vrot.slane %v2253_v13, 2 }
 0x28e   :  { %v2255_v15 = vadd.f32 %v2254_v14, %v2253_v13 }
 0x290   :  { %v2256_v16 = vrot.slane %v2255_v15, 1 }
 0x292   :  { %v2257_v17 = vadd.f32 %v2256_v16, %v2255_v15 }
 0x294   :  { %v2258_v18 = vmul.f32 0.125, %v2257_v17 }
 0x296   :  { %v2260_v19 = vadd.f32 1e-05, %v2258_v18 }
 0x298   :  { %3387 = vrsqrt.f32 %v2260_v19 }
 0x2a2   :  { %v3388_v25 = vpop.eup %3387 }
 0x2a3   :  { %v2262_v26 = vmul.f32 %v3388_v25, %v2259_v22 }
 0x2a5   :  { %v2266_v27 = vrot.slane %v2262_v26, %v2265_v23 }
 0x2a7   :  { %v2267_v29 = vmul.f32 %v2266_v27, %v2250_v10 }
 0x2a9   :  { %v2272_v30 = vadd.f32 %v2271_v28, %v2267_v29 }
 0x2ab   :  { %v2273_v31 = vmax.f32 %v2272_v30, 0.0 }
 0x2ad   :  { %v2276_v32 = vpack.c.bf16 %v2273_v31, %v2273_v31 }
 0x2af   :  { %3121 = vmatmul.mubr.bf16.vlgmr.msra.gmra.mrb[24].mxu1 %v2276_v32 }
 0x382   :  { %v2376_v41 = vpop.f32.mrb[24].mxu1 }
 0x383   :  { %v2382_v42 = vrot.slane %v2376_v41, 4  ;;  %v3122_v43 = vpop.f32.mrb[25].mxu1 }
 0x384   :  { %v2379_v44 = vpop.f32.mrb[26].mxu1 }
 0x385   :  { %v2383_v45 = vadd.f32 %v2382_v42, %v2376_v41  ;;  %v3123_v46 = vpop.f32.mrb[27].mxu1 }
 0x387   :  { %v2384_v47 = vrot.slane %v2383_v45, 2 }
 0x389   :  { %v2385_v49 = vadd.f32 %v2384_v47, %v2383_v45 }
 0x38b   :  { %v2386_v50 = vrot.slane %v2385_v49, 1 }
 0x38d   :  { %v2387_v51 = vadd.f32 %v2386_v50, %v2385_v49 }
 0x38f   :  { %v2388_v52 = vmul.f32 0.125, %v2387_v51 }
 0x391   :  { %v2389_v53 = vsub.f32 %v2376_v41, %v2388_v52 }
 0x393   :  { %v2390_v54 = vmul.f32 %v2389_v53, %v2389_v53 }
 0x395   :  { %v2391_v55 = vrot.slane %v2390_v54, 4 }
 0x397   :  { %v2392_v56 = vadd.f32 %v2391_v55, %v2390_v54 }
 0x399   :  { %v2393_v57 = vrot.slane %v2392_v56, 2 }
 0x39b   :  { %v2394_v58 = vadd.f32 %v2393_v57, %v2392_v56 }
 0x39d   :  { %v2395_v59 = vrot.slane %v2394_v58, 1 }
 0x39f   :  { %v2396_v48 = vadd.f32 %v2395_v59, %v2394_v58 }
 0x3a1   :  { %v2397_v60 = vmul.f32 0.125, %v2396_v48 }
 0x3a3   :  { %v2400_v61 = vadd.f32 1e-05, %v2397_v60 }
 0x3a5   :  { %3389 = vrsqrt.f32 %v2400_v61 }
 0x3af   :  { %v3390_v63 = vpop.eup %3389 }
 0x3b0   :  { %v2402_v0 = vmul.f32 %v3390_v63, %v2784_v62 }
 0x3b2   :  { %v2406_v1 = vrot.slane %v2402_v0, %v2265_v23 }
 0x3b4   :  { %v2407_v3 = vmul.f32 %v2406_v1, %v2389_v53 }
 0x3b6   :  { %v2412_v4 = vadd.f32 %v2411_v2, %v2407_v3 }
 0x3b8   :  { %v2413_v5 = vmax.f32 %v2412_v4, 0.0 }
 0x3ba   :  { %v2416_v6 = vpack.c.bf16 %v2413_v5, %v2413_v5 }
 0x3bc   :  { %3141 = vmatmul.mubr.bf16.vlgmr.msra.gmra.mrb[28].mxu0 %v2416_v6 }
 0x48f   :  { %v2515_v7 = vpop.f32.mrb[28].mxu0 }
 0x490   :  { %2521 = vst [vmem:[#allocation3] sm:$0xff] %v2515_v7  ;;  %v3142_v8 = vpop.f32.mrb[29].mxu0 }
 0x491   :  { %v2518_v9 = vpop.f32.mrb[30].mxu0 }
 0x492   :  { %3402 = shalt.err (!%p3399_p4)
}
 0x493   :  { %s3403_s0 = scalar_lea.hbm %s4189_s5, 128 }
 0x494   :  { %p3404_p5 = scmp.ne.s32.totalorder %s4189_s5, %s3403_s0  ;;  %p3407_p6 = scmp.lt.u32.totalorder %s3403_s0, %s4189_s5 }
 0x496   :  { %p3409_p7 = pnand %p3407_p6, %p3404_p5 }
 0x498   :  { %3412 = shalt.err (!%p3409_p7)
}
 0x499   :  { %2531 = dma.vmem_to_hbm [thread:$0]  %s2529_s23, 128, %s4189_s5, [#allocation4]   ;;  %v3143_v10 = vpop.f32.mrb[31].mxu0 }
 0x49a   :  { %3413 = dma.done.wait [#allocation4], 128  }
 0x49b   :  { %3414 = vsyncadd [#allocation4], 4294967168 }
 0x49c   :  { %2535 = vsyncpa [#allocation4], 1 }

</bundles_post_ra>
